<compile_context>
chip_gen: v7x
topology: tpu7x:2x2x1
jax: 0.10.0
libtpu: 0.0.40
codegen_flags: <defaults>
</compile_context>

<pallas_src>
import functools

import jax
import jax.numpy as jnp
from jax.experimental import pallas as pl
from jax.experimental.pallas import tpu as pltpu

LANES = 128     # lane tile
SUBLANES = 8    # f32 sublane tile


def _device_config():
    """(num_cores, max_block_rows) per TPU generation.

    v7x: 2 TensorCores/chip + ~3.2 TB/s HBM -> shard the stream across both TCs
         and use 4 MiB-per-input f32 blocks (8192 rows) to amortize the ~0.35 us
         per-grid-step overhead (2 inputs x 2 bufs x 4 MiB = 16 MiB VMEM).
    v5e/v6e: single TC -> no core axis (avoids the clamped duplicate block and
         the forced mask); 1 MiB blocks already reach ~85% of HBM roofline.
    A wrong guess only costs performance, never correctness.
    """
    try:
        kind = jax.devices()[0].device_kind.lower().replace(" ", "")
    except Exception:  # pragma: no cover
        kind = ""
    if "v7" in kind or "tpu7" in kind:
        return 2, 8192
    return 1, 2048


def _min_row_tile(dtype):
    # 32-bit dtypes: 8 sublanes; 16-bit: 16; 8-bit/bool: 32 (packed tiling).
    bits = jnp.dtype(dtype).itemsize * 8
    return max(SUBLANES, (32 * SUBLANES) // max(bits, 1))


def _dice_partial_kernel(x_ref, y_ref, out_ref, *, block_rows, blocks_per_core,
                         n_rows, needs_mask):
    c = pl.program_id(0)   # core axis ("parallel")
    j = pl.program_id(1)   # streaming/reduction axis ("arbitrary", last)

    @pl.when(j == 0)
    def _init():
        out_ref[...] = jnp.zeros_like(out_ref)

    # Upcast per tile; accumulate in f32.
    x = x_ref[...].astype(jnp.float32)
    y = y_ref[...].astype(jnp.float32)
    n_sub = block_rows // SUBLANES

    def accumulate(xv, yv):
        # Fold the block onto a single (8,128) vreg accumulator per quantity via
        # VPU tree adds; out_ref[0]=partial sum(x*y), out_ref[1]=partial sum(x+y).
        out_ref[0, :, :] += jnp.sum((xv * yv).reshape(n_sub, SUBLANES, LANES), axis=0)
        out_ref[1, :, :] += jnp.sum((xv + yv).reshape(n_sub, SUBLANES, LANES), axis=0)

    if not needs_mask:
        accumulate(x, y)
    else:
        # Only the ragged boundary block and clamped overflow steps pay the
        # iota/compare/select mask; every full block takes the unmasked path.
        step = c * blocks_per_core + j
        base = step * block_rows
        is_full = (base + block_rows) <= n_rows

        @pl.when(is_full)
        def _fast():
            accumulate(x, y)

        @pl.when(jnp.logical_not(is_full))
        def _masked():
            row = base + jax.lax.broadcasted_iota(jnp.int32, (block_rows, LANES), 0)
            valid = row < n_rows
            accumulate(jnp.where(valid, x, 0.0), jnp.where(valid, y, 0.0))


def dice_loss(logits, labels):
    """Pallas implementation of DiceLoss.forward. Returns a scalar float32."""
    x = logits.reshape(-1)
    y = labels.reshape(-1)
    assert x.shape == y.shape, "logits and labels must have the same number of elements"
    n = x.shape[0]

    num_cores, max_block_rows = _device_config()

    # Pad only to the next multiple of 128 so the (rows, 128) reshape is legal.
    # Ragged row counts / boundary blocks are handled by Pallas boundary clipping
    # plus the in-kernel mask, so we never pad up to the block size.
    n_pad = ((n + LANES - 1) // LANES) * LANES
    if n_pad != n:
        # TODO(synk): a <128-element tail still forces this full-array pad copy;
        # removing it needs 1-D element-granularity blocks (fragile Mosaic
        # reshapes). Lane-divisible inputs — the common case — skip it entirely.
        x = jnp.pad(x, (0, n_pad - n))
        y = jnp.pad(y, (0, n_pad - n))

    n_rows = n_pad // LANES
    min_rows = max(_min_row_tile(x.dtype), _min_row_tile(y.dtype))
    block_rows = min(max_block_rows,
                     ((n_rows + min_rows - 1) // min_rows) * min_rows)
    total_blocks = pl.cdiv(n_rows, block_rows)
    blocks_per_core = pl.cdiv(total_blocks, num_cores)
    needs_mask = (num_cores * blocks_per_core * block_rows) != n_rows

    x2 = x.reshape(n_rows, LANES)
    y2 = y.reshape(n_rows, LANES)

    def in_map(c, j):
        # Clamp so the auto-pipelined DMA never targets a fully out-of-range
        # block; the in-kernel mask zeroes any clamped re-read's contribution.
        return (jnp.minimum(c * blocks_per_core + j, total_blocks - 1), 0)

    kernel = functools.partial(
        _dice_partial_kernel,
        block_rows=block_rows,
        blocks_per_core=blocks_per_core,
        n_rows=n_rows,
        needs_mask=needs_mask,
    )

    parts = pl.pallas_call(
        kernel,
        out_shape=jax.ShapeDtypeStruct((num_cores, 2, SUBLANES, LANES), jnp.float32),
        grid=(num_cores, blocks_per_core),
        in_specs=[
            pl.BlockSpec((block_rows, LANES), in_map),
            pl.BlockSpec((block_rows, LANES), in_map),
        ],
        out_specs=pl.BlockSpec((None, 2, SUBLANES, LANES), lambda c, j: (c, 0, 0, 0)),
        compiler_params=pltpu.CompilerParams(
            # TODO(synk): on v7x, verify via xprof that "parallel" shards the
            # leading axis across both TensorCores; if not, switch that axis to
            # pltpu.CORE_PARALLEL.
            dimension_semantics=("parallel", "arbitrary"),
            vmem_limit_bytes=32 * 1024 * 1024,
        ),
    )(x2, y2)

    sums = jnp.sum(parts, axis=(0, 2, 3))   # (2,) -> [sum(x*y), sum(x)+sum(y)]
    inter, sxy = sums[0], sums[1]
    return (1.0 - (2.0 * inter + 1.0) / (sxy + 1.0)).astype(jnp.float32)


def dice_loss_ref(logits, labels):
    x = logits.reshape(-1).astype(jnp.float32)
    y = labels.reshape(-1).astype(jnp.float32)
    return 1.0 - (2.0 * jnp.sum(x * y) + 1.0) / (jnp.sum(x) + jnp.sum(y) + 1.0)


if __name__ == "__main__":
    key = jax.random.PRNGKey(0)
    k1, k2 = jax.random.split(key)
    # Small NCHW shapes: batch=2, channels=4, spatial=16x16
    logits = jax.nn.sigmoid(jax.random.normal(k1, (2, 4, 16, 16), dtype=jnp.float32))
    labels = (jax.random.uniform(k2, (2, 4, 16, 16)) > 0.5).astype(jnp.float32)

    loss_fn = jax.jit(dice_loss)
    loss = jax.block_until_ready(loss_fn(logits, labels))
    ref = jax.block_until_ready(dice_loss_ref(logits, labels))
    assert jnp.allclose(loss, ref, rtol=1e-5, atol=1e-5), (loss, ref)
    print("KERNEL_OK")
</pallas_src>

<mosaic_0001>
module attributes {stable_mosaic.version = 11 : i64} {
  func.func @_dice_partial_kernel(%arg0: i32, %arg1: i32, %arg2: memref<16x128xf32, #tpu.memory_space<vmem>>, %arg3: memref<16x128xf32, #tpu.memory_space<vmem>>, %arg4: memref<1x2x8x128xf32, #tpu.memory_space<vmem>>) attributes {dimension_semantics = [#tpu.dimension_semantics<parallel>, #tpu.dimension_semantics<arbitrary>], iteration_bounds = array<i64: 1, 1>, scalar_prefetch = 0 : i64, scratch_operands = 0 : i64, tpu.core_type = #tpu.core_type<tc>, window_params = [{transform_indices = @transform_0, window_bounds = array<i64: 16, 128>}, {transform_indices = @transform_1, window_bounds = array<i64: 16, 128>}, {transform_indices = @transform_2, window_bounds = array<i64: 1, 2, 8, 128>}]} {
    %c0_i32 = arith.constant 0 : i32
    %0 = arith.cmpi eq, %arg1, %c0_i32 : i32
    %1 = arith.extui %0 : i1 to i32
    %c0_i32_0 = arith.constant 0 : i32
    %2 = arith.cmpi ne, %1, %c0_i32_0 : i32
    scf.if %2 {
      %cst_20 = arith.constant 0.000000e+00 : f32
      %23 = vector.broadcast %cst_20 : f32 to vector<2x8x128xf32>
      %c0_21 = arith.constant 0 : index
      %c0_22 = arith.constant 0 : index
      %c0_23 = arith.constant 0 : index
      %c0_24 = arith.constant 0 : index
      %24 = vector.load %arg4[%c0_21, %c0_22, %c0_23, %c0_24] : memref<1x2x8x128xf32, #tpu.memory_space<vmem>>, vector<1x2x8x128xf32>
      %25 = vector.shape_cast %24 : vector<1x2x8x128xf32> to vector<2x8x128xf32>
      %26 = vector.shape_cast %23 : vector<2x8x128xf32> to vector<1x2x8x128xf32>
      tpu.vector_store %arg4[%c0_21, %c0_22, %c0_23, %c0_24], %26 {strides = array<i32>} : memref<1x2x8x128xf32, #tpu.memory_space<vmem>>, vector<1x2x8x128xf32>,
    } else {
    }
    %c0 = arith.constant 0 : index
    %c0_1 = arith.constant 0 : index
    %3 = vector.load %arg2[%c0, %c0_1] : memref<16x128xf32, #tpu.memory_space<vmem>>, vector<16x128xf32>
    %c0_2 = arith.constant 0 : index
    %c0_3 = arith.constant 0 : index
    %4 = vector.load %arg3[%c0_2, %c0_3] : memref<16x128xf32, #tpu.memory_space<vmem>>, vector<16x128xf32>
    %c0_4 = arith.constant 0 : index
    %c0_5 = arith.constant 0 : index
    %c0_6 = arith.constant 0 : index
    %c0_7 = arith.constant 0 : index
    %5 = vector.load %arg4[%c0_4, %c0_5, %c0_6, %c0_7] : memref<1x2x8x128xf32, #tpu.memory_space<vmem>>, vector<1x1x8x128xf32>
    %6 = vector.shape_cast %5 : vector<1x1x8x128xf32> to vector<8x128xf32>
    %7 = arith.mulf %3, %4 : vector<16x128xf32>
    %8 = vector.shape_cast %7 : vector<16x128xf32> to vector<2x8x128xf32>
    %cst = arith.constant dense<0.000000e+00> : vector<8x128xf32>
    %9 = vector.multi_reduction <add>, %8, %cst [0] : vector<2x8x128xf32> to vector<8x128xf32>
    %10 = arith.addf %6, %9 : vector<8x128xf32>
    %c0_8 = arith.constant 0 : index
    %c0_9 = arith.constant 0 : index
    %c0_10 = arith.constant 0 : index
    %c0_11 = arith.constant 0 : index
    %11 = vector.load %arg4[%c0_8, %c0_9, %c0_10, %c0_11] : memref<1x2x8x128xf32, #tpu.memory_space<vmem>>, vector<1x1x8x128xf32>
    %12 = vector.shape_cast %11 : vector<1x1x8x128xf32> to vector<8x128xf32>
    %13 = vector.shape_cast %10 : vector<8x128xf32> to vector<1x1x8x128xf32>
    tpu.vector_store %arg4[%c0_8, %c0_9, %c0_10, %c0_11], %13 {strides = array<i32>} : memref<1x2x8x128xf32, #tpu.memory_space<vmem>>, vector<1x1x8x128xf32>,
    %c0_12 = arith.constant 0 : index
    %c1 = arith.constant 1 : index
    %c0_13 = arith.constant 0 : index
    %c0_14 = arith.constant 0 : index
    %14 = vector.load %arg4[%c0_12, %c1, %c0_13, %c0_14] : memref<1x2x8x128xf32, #tpu.memory_space<vmem>>, vector<1x1x8x128xf32>
    %15 = vector.shape_cast %14 : vector<1x1x8x128xf32> to vector<8x128xf32>
    %16 = arith.addf %3, %4 : vector<16x128xf32>
    %17 = vector.shape_cast %16 : vector<16x128xf32> to vector<2x8x128xf32>
    %cst_15 = arith.constant dense<0.000000e+00> : vector<8x128xf32>
    %18 = vector.multi_reduction <add>, %17, %cst_15 [0] : vector<2x8x128xf32> to vector<8x128xf32>
    %19 = arith.addf %15, %18 : vector<8x128xf32>
    %c0_16 = arith.constant 0 : index
    %c1_17 = arith.constant 1 : index
    %c0_18 = arith.constant 0 : index
    %c0_19 = arith.constant 0 : index
    %20 = vector.load %arg4[%c0_16, %c1_17, %c0_18, %c0_19] : memref<1x2x8x128xf32, #tpu.memory_space<vmem>>, vector<1x1x8x128xf32>
    %21 = vector.shape_cast %20 : vector<1x1x8x128xf32> to vector<8x128xf32>
    %22 = vector.shape_cast %19 : vector<8x128xf32> to vector<1x1x8x128xf32>
    tpu.vector_store %arg4[%c0_16, %c1_17, %c0_18, %c0_19], %22 {strides = array<i32>} : memref<1x2x8x128xf32, #tpu.memory_space<vmem>>, vector<1x1x8x128xf32>,
    return
  }
  func.func @transform_0(%arg0: i32, %arg1: i32) -> (i32, i32) {
    %c1_i32 = arith.constant 1 : i32
    %0 = arith.muli %arg0, %c1_i32 : i32
    %1 = arith.addi %0, %arg1 : i32
    %c0_i32 = arith.constant 0 : i32
    %2 = arith.minsi %1, %c0_i32 : i32
    %c0_i32_0 = arith.constant 0 : i32
    %c0_i32_1 = arith.constant 0 : i32
    return %2, %c0_i32_0 : i32, i32
  }
  func.func @transform_1(%arg0: i32, %arg1: i32) -> (i32, i32) {
    %c1_i32 = arith.constant 1 : i32
    %0 = arith.muli %arg0, %c1_i32 : i32
    %1 = arith.addi %0, %arg1 : i32
    %c0_i32 = arith.constant 0 : i32
    %2 = arith.minsi %1, %c0_i32 : i32
    %c0_i32_0 = arith.constant 0 : i32
    %c0_i32_1 = arith.constant 0 : i32
    return %2, %c0_i32_0 : i32, i32
  }
  func.func @transform_2(%arg0: i32, %arg1: i32) -> (i32, i32, i32, i32) {
    %c0_i32 = arith.constant 0 : i32
    %c0_i32_0 = arith.constant 0 : i32
    %c0_i32_1 = arith.constant 0 : i32
    %c0_i32_2 = arith.constant 0 : i32
    return %arg0, %c0_i32, %c0_i32_0, %c0_i32_1 : i32, i32, i32, i32
  }
}

</mosaic_0001>

<bundles_post_ra>
// kernel: dice_loss.1
= control target key start
LH: loop header
LB: loop body
LE: loop exit
PB: predicated region body
PF: predicated region fallthrough
CT: control target
= control target key end

     0   :  { %s150_s0 = inlined_call_operand.vmem [shape: f32[16,128], index: 0, kind: input, shape index: {}]   ;;  %s151_s1 = inlined_call_operand.vmem [shape: f32[16,128], index: 1, kind: input, shape index: {}]   ;;  %s152_s2 = inlined_call_operand.vmem [shape: f32[1,2,8,128], index: 2, kind: output, shape index: {}]  }
   0x1   :  { %v81_v0 = vld [vmem:[%s150_s0] sm:$0xff]  ;;  %v82_v1 = vld [vmem:[%s150_s0 + $0x8] sm:$0xff] }
   0x2   :  { %v83_v2 = vld [vmem:[%s151_s1] sm:$0xff]  ;;  %v84_v3 = vld [vmem:[%s151_s1 + $0x8] sm:$0xff] }
   0x3   :  { %v86_v4 = vmul.f32 %v83_v2, %v81_v0  ;;  %v93_v5 = vadd.f32 %v83_v2, %v81_v0  ;;  %v87_v6 = vmul.f32 %v84_v3, %v82_v1  ;;  %v94_v7 = vadd.f32 %v84_v3, %v82_v1 }
   0x5   :  { %v88_v8 = vadd.f32 %v87_v6, %v86_v4  ;;  %v95_v9 = vadd.f32 %v94_v7, %v93_v5 }
   0x7   :  { %90 = vst [vmem:[%s152_s2] sm:$0xff] %v88_v8  ;;  %115 = vst [vmem:[%s152_s2 + $0x8] sm:$0xff] %v95_v9 }

</bundles_post_ra>
